<compile_context>
chip_gen: v7x
topology: tpu7x:2x2x1
jax: 0.10.0
libtpu: 0.0.40
codegen_flags: <defaults>
</compile_context>

<pallas_src>
import jax
import jax.numpy as jnp
import numpy as np
from jax.experimental import pallas as pl
from jax.experimental.pallas import tpu as pltpu


def _mm_kernel(clim_ref, sched_ref, bias_ref, w1c_ref, w1s_ref, b1_ref,
               w2l_ref, out_ref):
    """Fused timeseries_net (Conv1d k=1 + ReLU) + energy_net (Conv1d k=1).

    clim_ref  : (C, TILE_T) f32   one batch element's climate lane tile
    sched_ref : (S, TILE_T) f32   one batch element's schedule lane tile
    bias_ref  : (E, 1)      f32   per-batch bias = bf @ W2[:, :F].T + b2
    w1c_ref   : (L, C)      f32
    w1s_ref   : (L, S)      f32
    b1_ref    : (L, 1)      f32
    w2l_ref   : (E, L)      f32
    out_ref   : (E, TILE_T) f32
    """
    latent = (jnp.dot(w1c_ref[...], clim_ref[...],
                      preferred_element_type=jnp.float32)
              + jnp.dot(w1s_ref[...], sched_ref[...],
                        preferred_element_type=jnp.float32)
              + b1_ref[...])
    latent = jnp.maximum(latent, 0.0)                               # (L, TILE_T)
    out_ref[...] = jnp.dot(w2l_ref[...], latent,
                           preferred_element_type=jnp.float32) + bias_ref[...]


def multimodal_forward(building_features, climates, schedules,
                       w1, b1, w2, b2, *, max_tile=2048):
    """
    building_features: (B, F) f32
    climates:          (B, C, T) f32
    schedules:         (B, S, T) f32
    w1: (L, C+S)  b1: (L,)   -- timeseries_net (Conv1d k=1) weights
    w2: (E, F+L)  b2: (E,)   -- energy_net     (Conv1d k=1) weights
    returns preds: (B, E, T) f32
    """
    B, F = building_features.shape
    _, C, T = climates.shape
    _, S, _ = schedules.shape
    CS = C + S
    L = w1.shape[0]
    E = w2.shape[0]

    # --- wrapper-side algebra (cheap, weight/feature-sized XLA ops only) ----
    # Fold the building-features branch into a per-batch bias (exact identity).
    w2f, w2l = w2[:, :F], w2[:, F:]
    bf_bias = (building_features @ w2f.T + b2[None, :]).astype(jnp.float32)
    bf_bias = bf_bias.reshape(B, E, 1)                               # (B, E, 1)

    # Split w1 so the kernel consumes climates/schedules without a concat.
    w1c = w1[:, :C].astype(jnp.float32)                              # (L, C)
    w1s = w1[:, C:].astype(jnp.float32)                              # (L, S)
    b1_col = b1.reshape(L, 1).astype(jnp.float32)                    # (L, 1)

    # Lane tile: large multiple of 128, no divisibility requirement on T.
    # Ragged last tile is handled by Pallas with masked stores.
    tile_t = min(max_tile, ((T + 127) // 128) * 128)
    grid = (B, pl.cdiv(T, tile_t))

    cost = pl.CostEstimate(
        flops=2 * (L * CS + E * L) * B * T,
        transcendentals=0,
        bytes_accessed=4 * (B * CS * T            # climates + schedules
                            + B * E               # fused bias
                            + L * CS + L + E * L  # weights
                            + B * E * T),         # output
    )

    out = pl.pallas_call(
        _mm_kernel,
        out_shape=jax.ShapeDtypeStruct((B, E, T), jnp.float32),
        grid=grid,
        in_specs=[
            # climates tile: batch dim squeezed -> kernel sees (C, TILE_T)
            pl.BlockSpec((None, C, tile_t), lambda b, n: (b, 0, n)),
            # schedules tile -> kernel sees (S, TILE_T)
            pl.BlockSpec((None, S, tile_t), lambda b, n: (b, 0, n)),
            # per-batch fused bias column -> kernel sees (E, 1)
            pl.BlockSpec((None, E, 1), lambda b, n: (b, 0, 0)),
            # weights / bias (full-extent, resident across the grid)
            pl.BlockSpec((L, C), lambda b, n: (0, 0)),
            pl.BlockSpec((L, S), lambda b, n: (0, 0)),
            pl.BlockSpec((L, 1), lambda b, n: (0, 0)),
            pl.BlockSpec((E, L), lambda b, n: (0, 0)),
        ],
        out_specs=pl.BlockSpec((None, E, tile_t), lambda b, n: (b, 0, n)),
        compiler_params=pltpu.CompilerParams(
            dimension_semantics=("parallel", "parallel")),
        cost_estimate=cost,
    )(climates, schedules, bf_bias, w1c, w1s, b1_col, w2l)

    return out


def _reference(building_features, climates, schedules, w1, b1, w2, b2):
    """Pure-f32 reference (kernel keeps f32 end-to-end)."""
    F = building_features.shape[1]
    ts = jnp.concatenate([climates, schedules], axis=1)
    latent = jnp.einsum("lc,bct->blt", w1, ts) + b1[None, :, None]
    latent = jnp.maximum(latent, 0.0)
    w2f, w2l = w2[:, :F], w2[:, F:]
    bias = building_features @ w2f.T + b2[None, :]                   # (B, E)
    preds = jnp.einsum("el,blt->bet", w2l, latent) + bias[:, :, None]
    return preds


if __name__ == "__main__":
    # Small, deterministic example shapes (T deliberately not a multiple of 128
    # to exercise the ragged/masked last tile).
    B = 2          # batch
    F = 8          # n building features
    C = 4          # climate channels
    S = 4          # schedule channels
    T = 200        # timesteps
    L = 16         # latent channels (timeseries_net output)
    E = 8          # energy channels (energy_net output)

    key = jax.random.PRNGKey(0)
    k1, k2, k3, k4, k5, k6, k7 = jax.random.split(key, 7)

    building_features = jax.random.normal(k1, (B, F), dtype=jnp.float32)
    climates = jax.random.normal(k2, (B, C, T), dtype=jnp.float32)
    schedules = jax.random.uniform(k3, (B, S, T), dtype=jnp.float32)

    # Deterministic synthetic Conv1d (k=1) parameters, kernel dim squeezed.
    w1 = jax.random.normal(k4, (L, C + S), dtype=jnp.float32) * 0.1
    b1 = jax.random.normal(k5, (L,), dtype=jnp.float32) * 0.1
    w2 = jax.random.normal(k6, (E, F + L), dtype=jnp.float32) * 0.1
    b2 = jax.random.normal(k7, (E,), dtype=jnp.float32) * 0.1

    preds = multimodal_forward(building_features, climates, schedules,
                               w1, b1, w2, b2)
    preds = jax.block_until_ready(preds)
    assert preds.shape == (B, E, T)

    ref = _reference(building_features, climates, schedules, w1, b1, w2, b2)
    np.testing.assert_allclose(np.asarray(preds), np.asarray(ref),
                               rtol=1e-4, atol=1e-4)

    print("KERNEL_OK")
</pallas_src>

<mosaic_0001>
module attributes {stable_mosaic.version = 11 : i64} {
  func.func @_mm_kernel(%arg0: i32, %arg1: i32, %arg2: memref<1x4x256xf32, #tpu.memory_space<vmem>>, %arg3: memref<1x4x256xf32, #tpu.memory_space<vmem>>, %arg4: memref<1x8x1xf32, #tpu.memory_space<vmem>>, %arg5: memref<16x4xf32, #tpu.memory_space<vmem>>, %arg6: memref<16x4xf32, #tpu.memory_space<vmem>>, %arg7: memref<16x1xf32, #tpu.memory_space<vmem>>, %arg8: memref<8x16xf32, #tpu.memory_space<vmem>>, %arg9: memref<1x8x256xf32, #tpu.memory_space<vmem>>) attributes {dimension_semantics = [#tpu.dimension_semantics<parallel>, #tpu.dimension_semantics<parallel>], iteration_bounds = array<i64: 2, 1>, scalar_prefetch = 0 : i64, scratch_operands = 0 : i64, tpu.core_type = #tpu.core_type<tc>, window_params = [{transform_indices = @transform_0, window_bounds = array<i64: 1, 4, 256>}, {transform_indices = @transform_1, window_bounds = array<i64: 1, 4, 256>}, {transform_indices = @transform_2, window_bounds = array<i64: 1, 8, 1>}, {pipeline_mode = #tpu.pipeline_mode<synchronous>, transform_indices = @transform_3, window_bounds = array<i64: 16, 4>}, {pipeline_mode = #tpu.pipeline_mode<synchronous>, transform_indices = @transform_4, window_bounds = array<i64: 16, 4>}, {pipeline_mode = #tpu.pipeline_mode<synchronous>, transform_indices = @transform_5, window_bounds = array<i64: 16, 1>}, {pipeline_mode = #tpu.pipeline_mode<synchronous>, transform_indices = @transform_6, window_bounds = array<i64: 8, 16>}, {transform_indices = @transform_7, window_bounds = array<i64: 1, 8, 256>}]} {
    %c0 = arith.constant 0 : index
    %c0_0 = arith.constant 0 : index
    %0 = vector.load %arg5[%c0, %c0_0] : memref<16x4xf32, #tpu.memory_space<vmem>>, vector<16x4xf32>
    %c0_1 = arith.constant 0 : index
    %c0_2 = arith.constant 0 : index
    %c0_3 = arith.constant 0 : index
    %1 = vector.load %arg2[%c0_1, %c0_2, %c0_3] : memref<1x4x256xf32, #tpu.memory_space<vmem>>, vector<1x4x256xf32>
    %2 = vector.shape_cast %1 : vector<1x4x256xf32> to vector<4x256xf32>
    %cst = arith.constant dense<0.000000e+00> : vector<16x256xf32>
    %3 = tpu.matmul %0, %2, %cst {dimension_numbers = #tpu.dot_dimension_numbers<[1], [0], [0], [1], [0, 0, 1, 1], [], []>} : vector<16x4xf32>, vector<4x256xf32>, vector<16x256xf32> -> vector<16x256xf32>
    %c0_4 = arith.constant 0 : index
    %c0_5 = arith.constant 0 : index
    %4 = vector.load %arg6[%c0_4, %c0_5] : memref<16x4xf32, #tpu.memory_space<vmem>>, vector<16x4xf32>
    %c0_6 = arith.constant 0 : index
    %c0_7 = arith.constant 0 : index
    %c0_8 = arith.constant 0 : index
    %5 = vector.load %arg3[%c0_6, %c0_7, %c0_8] : memref<1x4x256xf32, #tpu.memory_space<vmem>>, vector<1x4x256xf32>
    %6 = vector.shape_cast %5 : vector<1x4x256xf32> to vector<4x256xf32>
    %cst_9 = arith.constant dense<0.000000e+00> : vector<16x256xf32>
    %7 = tpu.matmul %4, %6, %cst_9 {dimension_numbers = #tpu.dot_dimension_numbers<[1], [0], [0], [1], [0, 0, 1, 1], [], []>} : vector<16x4xf32>, vector<4x256xf32>, vector<16x256xf32> -> vector<16x256xf32>
    %8 = arith.addf %3, %7 : vector<16x256xf32>
    %c0_10 = arith.constant 0 : index
    %c0_11 = arith.constant 0 : index
    %9 = vector.load %arg7[%c0_10, %c0_11] : memref<16x1xf32, #tpu.memory_space<vmem>>, vector<16x1xf32>
    %10 = vector.broadcast %9 : vector<16x1xf32> to vector<16x256xf32>
    %11 = arith.addf %8, %10 : vector<16x256xf32>
    %cst_12 = arith.constant 0.000000e+00 : f32
    %12 = vector.broadcast %cst_12 : f32 to vector<16x256xf32>
    %13 = arith.maximumf %11, %12 : vector<16x256xf32>
    %c0_13 = arith.constant 0 : index
    %c0_14 = arith.constant 0 : index
    %14 = vector.load %arg8[%c0_13, %c0_14] : memref<8x16xf32, #tpu.memory_space<vmem>>, vector<8x16xf32>
    %cst_15 = arith.constant dense<0.000000e+00> : vector<8x256xf32>
    %15 = tpu.matmul %14, %13, %cst_15 {dimension_numbers = #tpu.dot_dimension_numbers<[1], [0], [0], [1], [0, 0, 1, 1], [], []>} : vector<8x16xf32>, vector<16x256xf32>, vector<8x256xf32> -> vector<8x256xf32>
    %c0_16 = arith.constant 0 : index
    %c0_17 = arith.constant 0 : index
    %c0_18 = arith.constant 0 : index
    %16 = vector.load %arg4[%c0_16, %c0_17, %c0_18] : memref<1x8x1xf32, #tpu.memory_space<vmem>>, vector<1x8x1xf32>
    %17 = vector.shape_cast %16 : vector<1x8x1xf32> to vector<8x1xf32>
    %18 = vector.broadcast %17 : vector<8x1xf32> to vector<8x256xf32>
    %19 = arith.addf %15, %18 : vector<8x256xf32>
    %c0_19 = arith.constant 0 : index
    %c0_20 = arith.constant 0 : index
    %c0_21 = arith.constant 0 : index
    %20 = vector.load %arg9[%c0_19, %c0_20, %c0_21] : memref<1x8x256xf32, #tpu.memory_space<vmem>>, vector<1x8x256xf32>
    %21 = vector.shape_cast %20 : vector<1x8x256xf32> to vector<8x256xf32>
    %22 = vector.shape_cast %19 : vector<8x256xf32> to vector<1x8x256xf32>
    tpu.vector_store %arg9[%c0_19, %c0_20, %c0_21], %22 {strides = array<i32>} : memref<1x8x256xf32, #tpu.memory_space<vmem>>, vector<1x8x256xf32>,
    return
  }
  func.func @transform_0(%arg0: i32, %arg1: i32) -> (i32, i32, i32) {
    %c0_i32 = arith.constant 0 : i32
    %c0_i32_0 = arith.constant 0 : i32
    return %arg0, %c0_i32, %arg1 : i32, i32, i32
  }
  func.func @transform_1(%arg0: i32, %arg1: i32) -> (i32, i32, i32) {
    %c0_i32 = arith.constant 0 : i32
    %c0_i32_0 = arith.constant 0 : i32
    return %arg0, %c0_i32, %arg1 : i32, i32, i32
  }
  func.func @transform_2(%arg0: i32, %arg1: i32) -> (i32, i32, i32) {
    %c0_i32 = arith.constant 0 : i32
    %c0_i32_0 = arith.constant 0 : i32
    %c0_i32_1 = arith.constant 0 : i32
    return %arg0, %c0_i32, %c0_i32_0 : i32, i32, i32
  }
  func.func @transform_3(%arg0: i32, %arg1: i32) -> (i32, i32) {
    %c0_i32 = arith.constant 0 : i32
    %c0_i32_0 = arith.constant 0 : i32
    %c0_i32_1 = arith.constant 0 : i32
    return %c0_i32, %c0_i32_0 : i32, i32
  }
  func.func @transform_4(%arg0: i32, %arg1: i32) -> (i32, i32) {
    %c0_i32 = arith.constant 0 : i32
    %c0_i32_0 = arith.constant 0 : i32
    %c0_i32_1 = arith.constant 0 : i32
    return %c0_i32, %c0_i32_0 : i32, i32
  }
  func.func @transform_5(%arg0: i32, %arg1: i32) -> (i32, i32) {
    %c0_i32 = arith.constant 0 : i32
    %c0_i32_0 = arith.constant 0 : i32
    %c0_i32_1 = arith.constant 0 : i32
    return %c0_i32, %c0_i32_0 : i32, i32
  }
  func.func @transform_6(%arg0: i32, %arg1: i32) -> (i32, i32) {
    %c0_i32 = arith.constant 0 : i32
    %c0_i32_0 = arith.constant 0 : i32
    %c0_i32_1 = arith.constant 0 : i32
    return %c0_i32, %c0_i32_0 : i32, i32
  }
  func.func @transform_7(%arg0: i32, %arg1: i32) -> (i32, i32, i32) {
    %c0_i32 = arith.constant 0 : i32
    %c0_i32_0 = arith.constant 0 : i32
    return %arg0, %c0_i32, %arg1 : i32, i32, i32
  }
}

</mosaic_0001>

<bundles_post_ra>
// kernel: tpu_custom_call.1
= control target key start
LH: loop header
LB: loop body
LE: loop exit
PB: predicated region body
PF: predicated region fallthrough
CT: control target
= control target key end

     0   :  { %12 = vsyncpa [#allocation3], 0  ;;  %s1133_s0 = inlined_call_operand.vmem [shape: f32[2,4,200], index: 0, kind: input, shape index: {}]   ;;  %s1134_s1 = inlined_call_operand.vmem [shape: f32[2,4,200], index: 1, kind: input, shape index: {}]   ;;  %s1135_s2 = inlined_call_operand.vmem [shape: f32[2,8,1], index: 2, kind: input, shape index: {}]   ;;  %s1136_s3 = inlined_call_operand.vmem [shape: f32[16,4], index: 3, kind: input, shape index: {}]   ;;  %s1137_s4 = inlined_call_operand.vmem [shape: f32[16,4], index: 4, kind: input, shape index: {}]   ;;  %s1138_s5 = inlined_call_operand.vmem [shape: f32[16,1], index: 5, kind: input, shape index: {}]   ;;  %s1139_s6 = inlined_call_operand.vmem [shape: f32[8,16], index: 6, kind: input, shape index: {}]   ;;  %s1140_s7 = inlined_call_operand.hbm [shape: f32[2,8,200], index: 7, kind: output, shape index: {}]  }
   0x1   :  { %14 = vsyncpa [#allocation3 + $0x1], 0  ;;  %s994_s24 = smov 0   ;;  %s996_s25 = smov 0  }
   0x2   :  { %s998_s26 = smov 0   ;;  %s1000_s27 = smov 0  }
   0x3   :  { %s1002_s28 = smov 0   ;;  %s1004_s29 = smov 0  }
   0x4 LB: > { %s774_s30 = sadd.s32 4294967295, %s949_s29   ;;  %s775_s8 = sadd.s32 4294967294, %s949_s29   ;;  %s949_s29 = sphi %s1004_s29, %s20_s29   ;;  %s945_s28 = sphi %s1002_s28, %s1147_s28   ;;  %s941_s27 = sphi %s1000_s27, %s1146_s27   ;;  %s937_s26 = sphi %s998_s26, %s1145_s26   ;;  %s933_s25 = sphi %s996_s25, %s1144_s25   ;;  %s929_s24 = sphi %s994_s24, %s1143_s24  }
   0x5   : > { %s32_s9 = sadd.s32 1, %s945_s28  ;;  %s207_s10 = sadd.s32 1, %s937_s26 }
   0x6   : > { %p34_p0 = scmp.ge.s32.totalorder %s32_s9, 2  ;;  %p217_p1 = scmp.ne.s32.totalorder %s937_s26, %s933_s25 }
   0x7   : > { %p218_p2 = scmp.eq.s32.totalorder %s774_s30, 1  ;;  %p223_p3 = scmp.ne.s32.totalorder %s933_s25, %s929_s24 }
   0x8   : > { %s1149_s9 = smov (%p34_p0, %s32_s9), 0  ;;  %p224_p5 = scmp.eq.s32.totalorder %s775_s8, 1 }
   0x9   : > { %p1034_p4 = por %p218_p2, %p217_p1  ;;  %s202_s12 = ssub.s32 %s945_s28, %s1149_s9 }
   0xa   : > { %p778_p6 = scmp.ge.s32.totalorder %s949_s29, 1  ;;  %p205_p7 = scmp.eq.s32.totalorder %s202_s12, 0 }
   0xb   : > { %p1041_p8 = por %p224_p5, %p223_p3  ;;  %p287_p9 = scmp.lt.s32.totalorder %s949_s29, 3 }
   0xc   : > { %s1047_s14 = scalar_select %p205_p7, %s937_s26, %s207_s10  }
   0xd   : > { %p288_p10 = pnand %p778_p6, %p287_p9 }
   0xe   : > { %p337_p11 = scmp.lt.s32.totalorder (!%p288_p10), %s941_s27, 1  ;;  %v951_v0 = vmov (!%p288_p10), 0.0   ;;  %v547_v1 = vld [vmem:[%s1138_s5] sm:$0xff] (!%p288_p10)  ;;  %v952_v2 = vmov (!%p288_p10), 0   ;;  %v548_v3 = vld [vmem:[%s1138_s5 + $0x8] sm:$0xff] (!%p288_p10)  ;;  %vm376_vm0 = vcmask (!%p288_p10), 1043456  }
   0xf   : > { %291 = sbr.rel (%p288_p10) target bundleno = 490 (0x1ea), region = 48  ;;  %445 = vmatprep.mubr.f32.mxu1 (!%p288_p10), %v951_v0  ;;  %534 = vmatprep.mubr.f32.mxu0 (!%p288_p10), %v951_v0  ;;  %v364_v8 = vld [vmem:[%s1137_s4] sm:$0xff] (!%p288_p10)  ;;  %vm369_vm1 = vcmask (!%p288_p10), 31744   ;;  %v365_v10 = vld [vmem:[%s1137_s4 + $0x8] sm:$0xff] (!%p288_p10)  ;;  %vm574_vm2 = vcmask (!%p288_p10), 130048   ;;  %s333_s12 = sand.u32 (!%p288_p10), 1, %s933_s25  }
  0x10   : > { %867 = vset.pattern.permute.xlu0 (!%p288_p10), %v952_v2  ;;  %868 = vset.pattern.permute.xlu1 (!%p288_p10), %v952_v2  ;;  %v361_v9 = vld [vmem:[%s1136_s3] sm:$0xff] (!%p288_p10)  ;;  %v362_v11 = vld [vmem:[%s1136_s3 + $0x8] sm:$0xff] (!%p288_p10)  ;;  %s779_s15 = sshll.u32 (!%p288_p10), %s333_s12, 4  ;;  %s801_s16 = sshll.u32 (!%p288_p10), %s941_s27, 8 }
  0x11   : > { %551 = vperm.xlu0 (!%p288_p10), %867, %v547_v1   ;;  %v567_v37 = vld [vmem:[%s1139_s6] sm:$0xff] (!%p288_p10)  ;;  %s1086_s22 = scalar_lea.hbm (!%p288_p10), %s1140_s7, %s801_s16  ;;  %s953_s30 = smov (!%p288_p10), [#allocation2]  }
  0x15   : > { %556 = vperm.xlu0 (!%p288_p10), %867, %v548_v3  }
  0x16   : > { %s338_s17 = scalar_select %p337_p11, %s941_s27, 1 }
  0x18   : > { %s799_s18 = sshll.u32 %s338_s17, 3  ;;  %s335_s17 = scalar_lea.vmem [#allocation2], %s779_s15 }
  0x19   : > { %s354_s23 = scalar_lea.vmem %s1134_s1, %s799_s18  ;;  %s344_s10 = scalar_lea.vmem %s1133_s0, %s799_s18 }
  0x1a   : > { %v366_v4 = vld [vmem:[%s354_s23] sm:$0xff]  ;;  %s359_s8 = scalar_lea.vmem %s1135_s2, %s799_s18  ;;  %s668_s19 = sshll.u32 %s335_s17, 4  ;;  %s1088_s19 = int_to_ptr.vmem [resolvable:$true] %s668_s19 }
  0x1b   : > { %v363_v5 = vld [vmem:[%s344_s10] sm:$0xff]  ;;  %v368_v6 = vcombine.high %v366_v4, %v366_v4  ;;  %s652_s23 = scalar_lea.sflag [#allocation3], %s333_s12  ;;  %s871_s27 = scalar_lea.vmem %s1088_s19, 256 }
  0x1c   : > { %v459_v7 = vcombine.high %v363_v5, %v363_v5  ;;  %v568_v12 = vld [vmem:[%s359_s8] sm:$0xff]  ;;  %p872_p12 = scmp.ne.s32.totalorder %s1088_s19, %s871_s27  ;;  %s875_s8 = sshll.u32 %s953_s30, 4  ;;  %s876_s8 = int_to_ptr.vmem [resolvable:$false] %s875_s8 }
  0x1d   : > { %785 = vmatprep.subr.msk.mxu1 %vm376_vm0, %v368_v6  ;;  %571 = vperm.xlu1 %868, %v568_v12   ;;  %s877_s18 = scalar_lea.vmem %s876_s8, 512  ;;  %p878_p1 = scmp.lt.s32.totalorder %s1088_s19, %s876_s8 }
  0x1e   : > { %789 = vmatprep.subr.msk.mxu0 %vm376_vm0, %v459_v7  ;;  %786 = vmatpush1.msk.msra.mxu1 %vm376_vm0, %v366_v4  ;;  %p873_p13 = pnand %p872_p12, %p1034_p4  ;;  %p879_p2 = scmp.lt.s32.totalorder %s877_s18, %s871_s27 }
  0x1f   : > { %790 = vmatpush1.msk.msra.mxu0 %vm376_vm0, %v363_v5  ;;  %787 = vmatmul.mubr.msk.f32.vlgmr.msra.gmra.mrb[0].mxu1 %vm369_vm1, %v364_v8 }
  0x20   : > { %791 = vmatmul.mubr.msk.f32.vlgmr.msra.gmra.mrb[0].mxu0 %vm369_vm1, %v361_v9  ;;  %451 = vmatprep.mubr.f32.mxu1 %v951_v0  ;;  %p874_p0 = pneg %p873_p13  ;;  %p880_p3 = por %p879_p2, %p878_p1 }
  0x21   : > { %540 = vmatprep.mubr.f32.mxu0 %v951_v0 }
  0x22   : > { %p881_p5 = pnand %p880_p3, %p874_p0 }
  0x23   : > { %788 = vmatmul.mubr.msk.f32.gmra.mrb[2].mxu1 %vm369_vm1, %v365_v10 }
  0x24   : > { %792 = vmatmul.mubr.msk.f32.gmra.mrb[2].mxu0 %vm369_vm1, %v362_v11  ;;  %642 = vmatprep.mubr.f32.mxu1 %v951_v0 }
  0x90   : > { %v552_v13 = vpop.permute.xlu0 %551 }
  0x94   : > { %v557_v27 = vpop.permute.xlu0 %556 }
  0x9c   : > { %v572_v38 = vpop.permute.xlu1 %571 }
  0xf2   : > { %v447_v14 = vpop.f32.mrb[0].mxu1 }
  0xf3   : > { %v536_v15 = vpop.f32.mrb[0].mxu0  ;;  %v449_v17 = vpop.f32.mrb[1].mxu1 }
  0xf4   : > { %v537_v16 = vadd.f32 %v536_v15, %v447_v14  ;;  %v538_v18 = vpop.f32.mrb[1].mxu0 }
  0xf5   : > { %v539_v19 = vadd.f32 %v538_v18, %v449_v17 }
  0xf6   : > { %v453_v20 = vpop.f32.mrb[2].mxu1  ;;  %v559_v22 = vadd.f32 %v552_v13, %v537_v16 }
  0xf7   : > { %v542_v21 = vpop.f32.mrb[2].mxu0  ;;  %v455_v24 = vpop.f32.mrb[3].mxu1  ;;  %v560_v26 = vadd.f32 %v552_v13, %v539_v19 }
  0xf8   : > { %v543_v23 = vadd.f32 %v542_v21, %v453_v20  ;;  %v544_v25 = vpop.f32.mrb[3].mxu0  ;;  %v563_v31 = vmax.f32 %v559_v22, 0.0 }
  0xf9   : > { %v545_v28 = vadd.f32 %v544_v25, %v455_v24  ;;  %v564_v33 = vmax.f32 %v560_v26, 0.0 }
  0xfa   : > { %v561_v29 = vadd.f32 %v557_v27, %v543_v23 }
  0xfb   : > { %v562_v30 = vadd.f32 %v557_v27, %v545_v28 }
  0xfc   : > { %v565_v32 = vmax.f32 %v561_v29, 0.0 }
  0xfd   : > { %v566_v34 = vmax.f32 %v562_v30, 0.0 }
  0xfe   : > { %v804_v35 = vpack.c.bf16 %v565_v32, %v563_v31 }
  0xff   : > { %v802_v36 = vpack.c.bf16 %v566_v34, %v564_v33 }
 0x101   : > { %803 = vmatprep.subr.bf16.mxu1 %v802_v36 }
 0x102   : > { %805 = vmatpush1.bf16.msra.mxu1 %v804_v35 }
 0x105   : > { %793 = vmatmul.mubr.msk.f32.vlgmr.msra.gmra.mrb[4].mxu1 %vm574_vm2, %v567_v37 }
 0x1d8   : > { %v644_v39 = vpop.f32.mrb[4].mxu1 }
 0x1d9   : > { %v645_v40 = vadd.f32 %v644_v39, %v572_v38  ;;  %v646_v41 = vpop.f32.mrb[5].mxu1 }
 0x1da   : > { %v647_v42 = vadd.f32 %v646_v41, %v572_v38 }
 0x1db   : > { %649 = vst [vmem:[%s335_s17] sm:$0xff] %v645_v40 }
 0x1dc   : > { %650 = vst [vmem:[%s335_s17 + $0x8] sm:$0xff] %v647_v42 }
 0x1dd   : > { %884 = shalt.err (!%p881_p5)
}
 0x1de   : > { %s885_s10 = scalar_lea.hbm %s1086_s22, 256  ;;  %s889_s16 = scalar_lea.hbm %s1140_s7, 512 }
 0x1df   : > { %p886_p6 = scmp.ne.s32.totalorder %s1086_s22, %s885_s10  ;;  %p890_p10 = scmp.lt.u32.totalorder %s1086_s22, %s1140_s7 }
 0x1e0   : > { %p891_p11 = scmp.lt.u32.totalorder %s889_s16, %s885_s10  ;;  %p893_p13 = scmp.lt.u32.totalorder %s885_s10, %s1086_s22 }
 0x1e1   : > { %p887_p7 = pnand %p886_p6, %p1034_p4 }
 0x1e2   : > { %p892_p12 = por %p891_p11, %p890_p10 }
 0x1e3   : > { %p888_p9 = pneg %p887_p7 }
 0x1e4   : > { %p894_p0 = por %p893_p13, %p892_p12 }
 0x1e6   : > { %p895_p1 = pnand %p894_p0, %p888_p9 }
 0x1e8   : > { %898 = shalt.err (!%p895_p1)
}
 0x1e9   : > { %810 = dma.vmem_to_hbm [thread:$0]  (%p1034_p4), %s1088_s19, 256, %s1086_s22, %s652_s23  }
 0x1ea PF: > { %p816_p2 = scmp.ge.s32.totalorder %s949_s29, 2  ;;  %s680_s21 = sand.u32 1, %s929_s24  }
 0x1eb   : > { %s681_s27 = scalar_lea.sflag [#allocation3], %s680_s21 }
 0x1ec   : > { %p813_p3 = pnand %p816_p2, %p1041_p8 }
 0x1ee   : > { %924 = dma.done.wait (!%p813_p3), %s681_s27, 256  }
 0x1ef   : > { %926 = vsyncadd (!%p813_p3), %s681_s27, 4294967040  ;;  %s20_s29 = sadd.s32 1, %s949_s29   ;;  %s1143_s24 = smov %s933_s25 }
 0x1f0   : > { %p17_p5 = scmp.ge.s32.totalorder %s20_s29, 4   ;;  %s1144_s25 = smov %s937_s26 }
 0x1f1   : > { %s1145_s26 = smov %s1047_s14  ;;  %s1146_s27 = smov %s945_s28 }
 0x1f2   : > { %s1147_s28 = smov %s1149_s9  ;;  %19 = sbr.rel (!%p17_p5) target bundleno = 4 (0x4), region = 89 }
 0x1f9   :  { %686 = vsyncpa [#allocation3], 1 }
 0x1fa   :  { %688 = vsyncpa [#allocation3 + $0x1], 1 }

</bundles_post_ra>
